<compile_context>
chip_gen: v6e
topology: v6e:2x2x1
jax: 0.10.0
libtpu: 0.0.40
codegen_flags: <defaults>
</compile_context>

<pallas_src>
import functools

import jax
import jax.numpy as jnp
from jax import lax
from jax.experimental import pallas as pl
from jax.experimental.pallas import tpu as pltpu


def _round_up(x: int, m: int) -> int:
    return ((x + m - 1) // m) * m


def _vmem_budget_and_limit():
    """Generation-aware (working-set budget, vmem_limit_bytes)."""
    try:
        cap = int(pltpu.get_tpu_info().vmem_capacity_bytes)
    except Exception:
        cap = 64 << 20                      # conservative fallback (v7x-sized)
    if cap >= (96 << 20):                   # v5e / v6e: 128 MiB physical VMEM
        return 56 << 20, 96 << 20
    return 20 << 20, 40 << 20               # v7x: 64 MiB physical per TensorCore


def _choose_tile_t(T: int, C: int, ci_p: int, co_p: int, K: int,
                   itemsize: int, budget_bytes: int) -> int:
    """Largest lane-aligned time tile whose working set fits the VMEM budget."""
    if T < 128:
        return T                            # tiny sequences: a single full block
    # Fixed residents: conv weights (double-buffered for now), params, halo blocks.
    fixed = 2 * K * co_p * ci_p * itemsize + 6 * C * 4 + 4 * C * 128 * itemsize
    # Per-time-column bytes: x/out blocks (double-buffered) + in-kernel temporaries
    # (window + ~2 live tap slices in x dtype, f32 accumulator, ~4 f32 LN temps).
    per_col = 4 * C * itemsize + 3 * ci_p * itemsize + co_p * 4 + 4 * C * 4
    avail = max(budget_bytes - fixed, per_col * 128)
    tile = min(avail // per_col, 2048)
    tile = max(128, (tile // 128) * 128)
    tile = min(tile, (T // 128) * 128)      # never let the block exceed the array
    return int(tile)


def _pad2d(a, pad_rows: int, pad_cols: int):
    """Zero-pad a 2-D VMEM value on the bottom/right (concat-based; identity if 0)."""
    if pad_rows:
        a = jnp.concatenate([a, jnp.zeros((pad_rows, a.shape[1]), a.dtype)], axis=0)
    if pad_cols:
        a = jnp.concatenate([a, jnp.zeros((a.shape[0], pad_cols), a.dtype)], axis=1)
    return a


def _causal_conv_block_kernel(x_ref, halo_ref, w_ref, b_ref, g_ref, beta_ref, o_ref,
                              *, kernel_size: int, c_real: int, ci_p: int, tt_p: int,
                              h_lane: int, residual: bool, eps: float):
    # x_ref    : (1, C, TILE_T)   NCT tile (channels on sublanes, time on lanes)
    # halo_ref : (1, C, h_lane)   last h_lane time columns of the previous tile
    # w_ref    : (K, co_p, ci_p)  conv weights, w[k, co, ci] (input dtype)
    # b_ref/g_ref/beta_ref : (C, 1) f32 conv bias / LN gamma / LN beta
    # o_ref    : (1, C, TILE_T)
    K = kernel_size
    xt = x_ref[0]                                   # (C, tile_t), input dtype
    tile_t = xt.shape[-1]

    # VMEM-only padding to MXU-friendly extents (identity when already aligned).
    xt_p = _pad2d(xt, ci_p - c_real, tt_p - tile_t)          # (ci_p, tt_p)

    # k = K-1 tap: no time shift -> use the padded tile directly (no relayout).
    acc = jnp.dot(w_ref[K - 1], xt_p, preferred_element_type=jnp.float32)

    if K > 1:
        # Causal left halo = last K-1 columns of the previous tile (zeros for tile 0).
        if h_lane >= K - 1:
            tail = halo_ref[0][:, h_lane - (K - 1):]          # (C, K-1)
            tail = jnp.where(pl.program_id(1) == 0, jnp.zeros_like(tail), tail)
        else:  # only possible when the whole sequence is a single tile
            tail = jnp.zeros((c_real, K - 1), xt.dtype)
        tail_p = _pad2d(tail, ci_p - c_real, 0)               # (ci_p, K-1)
        window = jnp.concatenate([tail_p, xt_p], axis=1)      # (ci_p, tt_p + K - 1)

        # Remaining taps: K-1 accumulating MXU matmuls (no im2col slab).
        for k in range(K - 1):
            acc = acc + jnp.dot(w_ref[k], window[:, k:k + tt_p],
                                preferred_element_type=jnp.float32)

    # Bias / ReLU / LayerNorm on the REAL channel rows only (exact stats by construction).
    conv = acc[:c_real, :] + b_ref[...]                       # (C, tt_p), f32
    relu = jnp.maximum(conv, 0.0)
    inv_c = 1.0 / c_real
    mean = jnp.sum(relu, axis=0, keepdims=True) * inv_c       # (1, tt_p)
    diff = relu - mean
    var = jnp.sum(diff * diff, axis=0, keepdims=True) * inv_c
    y = diff * lax.rsqrt(var + eps) * g_ref[...] + beta_ref[...]

    y = y[:, :tile_t]                                         # drop VMEM time padding
    if residual:
        y = y + xt.astype(jnp.float32)
    o_ref[0] = y.astype(o_ref.dtype)


def causal_conv_block(x, conv_weight, conv_bias, gamma, beta,
                      *, kernel_size: int = 3, residual: bool = False,
                      eps: float = 1e-5, tile_t: int | None = None):
    """x: (B, C, T) (PyTorch NCT).  conv_weight: (C_out, C_in, K) (PyTorch Conv1d layout).
    Returns (B, C, T), matching CausalConvBlock.forward.  No HBM relayout of x."""
    B, C, T = x.shape
    K = kernel_size
    assert conv_weight.shape == (C, C, K)
    itemsize = jnp.dtype(x.dtype).itemsize

    ci_p = _round_up(C, 128)      # contraction (C_in) padded: lanes of the weight tile
    co_p = _round_up(C, 8)        # output channels padded to sublane granularity

    budget, vmem_limit = _vmem_budget_and_limit()
    if tile_t is None:
        tile_t = _choose_tile_t(T, C, ci_p, co_p, K, itemsize, budget)
    elif T >= 128:
        assert tile_t % 128 == 0 and tile_t <= T, "tile_t must be a 128-multiple <= T"
    else:
        tile_t = T
    tt_p = _round_up(tile_t, 128)
    h_lane = 128 if T >= 128 else T          # lane-aligned halo read width
    r = tile_t // h_lane                     # halo blocks per time tile
    n_t = -(-T // tile_t)                    # partial last tile handled by masked stores

    # Tiny parameter arrays (negligible HBM traffic).  Weights stay in x.dtype so
    # bf16 activations feed the bf16-native MXU without upcasts.
    w = jnp.transpose(conv_weight, (2, 0, 1))                               # (K, C_out, C_in)
    w = jnp.pad(w, ((0, 0), (0, co_p - C), (0, ci_p - C))).astype(x.dtype)  # (K, co_p, ci_p)
    b2 = conv_bias.reshape(C, 1).astype(jnp.float32)
    g2 = gamma.reshape(C, 1).astype(jnp.float32)
    be2 = beta.reshape(C, 1).astype(jnp.float32)

    kernel = functools.partial(_causal_conv_block_kernel,
                               kernel_size=K, c_real=C, ci_p=ci_p, tt_p=tt_p,
                               h_lane=h_lane, residual=residual, eps=eps)

    flops = 2 * B * T * K * C * C + 10 * B * T * C
    bytes_accessed = (itemsize * (2 * B * C * T + B * n_t * C * h_lane
                                  + K * co_p * ci_p) + 3 * C * 4)
    cost = pl.CostEstimate(flops=flops, transcendentals=B * T,
                           bytes_accessed=bytes_accessed)

    out = pl.pallas_call(
        kernel,
        out_shape=jax.ShapeDtypeStruct((B, C, T), x.dtype),
        grid_spec=pltpu.PrefetchScalarGridSpec(
            num_scalar_prefetch=0,
            grid=(B, n_t),
            in_specs=[
                # current NCT time tile (time on lanes -> lane-dense loads/stores)
                pl.BlockSpec((1, C, tile_t), lambda b, t: (b, 0, t)),
                # causal halo: last 128 time columns of the previous tile (clamped)
                pl.BlockSpec((1, C, h_lane),
                             lambda b, t: (b, 0, jnp.maximum(t * r - 1, 0))),
                # grid-invariant operands (index never changes -> fetched once)
                pl.BlockSpec((K, co_p, ci_p), lambda b, t: (0, 0, 0)),
                pl.BlockSpec((C, 1), lambda b, t: (0, 0)),
                pl.BlockSpec((C, 1), lambda b, t: (0, 0)),
                pl.BlockSpec((C, 1), lambda b, t: (0, 0)),
            ],
            out_specs=pl.BlockSpec((1, C, tile_t), lambda b, t: (b, 0, t)),
        ),
        compiler_params=pltpu.CompilerParams(
            dimension_semantics=("parallel", "parallel"),   # both TCs on v7x megacore
            vmem_limit_bytes=vmem_limit,
        ),
        cost_estimate=cost,
    )(x, x, w, b2, g2, be2)
    return out


def _reference(x, conv_weight, conv_bias, gamma, beta, *, kernel_size=3,
               residual=False, eps=1e-5):
    """Pure-JAX reference mirroring the PyTorch forward."""
    B, C, T = x.shape
    K = kernel_size
    xpad = jnp.pad(x, ((0, 0), (0, 0), (K - 1, 0)))                      # (B, C, T+K-1)
    conv = jnp.zeros((B, C, T), jnp.float32)
    for k in range(K):
        conv = conv + jnp.einsum('bct,oc->bot', xpad[:, :, k:k + T], conv_weight[:, :, k])
    conv = conv + conv_bias[None, :, None]
    relu = jnp.maximum(conv, 0.0)
    y = jnp.transpose(relu, (0, 2, 1))                                   # (B, T, C)
    mean = jnp.mean(y, axis=-1, keepdims=True)
    var = jnp.mean((y - mean) ** 2, axis=-1, keepdims=True)
    y = (y - mean) * jax.lax.rsqrt(var + eps) * gamma + beta
    y = jnp.transpose(y, (0, 2, 1))                                      # (B, C, T)
    return x + y if residual else y


if __name__ == "__main__":
    def run_case(B, C, T, K, residual, tile_t=None):
        key = jax.random.PRNGKey(0)
        kx, kw, kb = jax.random.split(key, 3)
        x = jax.random.normal(kx, (B, C, T), dtype=jnp.float32)
        conv_weight = 0.2 * jax.random.normal(kw, (C, C, K), dtype=jnp.float32)
        conv_bias = 0.1 * jax.random.normal(kb, (C,), dtype=jnp.float32)
        gamma = jnp.ones((C,), dtype=jnp.float32)      # LayerNorm default init
        beta = jnp.zeros((C,), dtype=jnp.float32)

        out = causal_conv_block(x, conv_weight, conv_bias, gamma, beta,
                                kernel_size=K, residual=residual, tile_t=tile_t)
        out = jax.block_until_ready(out)
        ref = _reference(x, conv_weight, conv_bias, gamma, beta,
                         kernel_size=K, residual=residual)
        assert out.shape == (B, C, T)
        assert jnp.allclose(out, ref, atol=1e-5, rtol=1e-5), \
            f"mismatch vs reference (B={B}, C={C}, T={T}, residual={residual})"

    # Required small shape (single tile), both residual modes.
    for residual in (False, True):
        run_case(2, 4, 16, 3, residual)
    # Multi-tile: exercises the in-kernel causal halo fetched from x itself.
    run_case(2, 4, 256, 3, True, tile_t=128)
    # Non-divisible T: partial last time tile (masked stores).
    run_case(1, 4, 200, 3, False, tile_t=128)

    print("KERNEL_OK")
</pallas_src>

<mosaic_0001>
module attributes {stable_mosaic.version = 11 : i64} {
  func.func @_causal_conv_block_kernel(%arg0: i32, %arg1: i32, %arg2: memref<1x4x16xf32, #tpu.memory_space<vmem>>, %arg3: memref<1x4x16xf32, #tpu.memory_space<vmem>>, %arg4: memref<3x8x128xf32, #tpu.memory_space<vmem>>, %arg5: memref<4x1xf32, #tpu.memory_space<vmem>>, %arg6: memref<4x1xf32, #tpu.memory_space<vmem>>, %arg7: memref<4x1xf32, #tpu.memory_space<vmem>>, %arg8: memref<1x4x16xf32, #tpu.memory_space<vmem>>) attributes {dimension_semantics = [#tpu.dimension_semantics<parallel>, #tpu.dimension_semantics<parallel>], iteration_bounds = array<i64: 2, 1>, scalar_prefetch = 0 : i64, scratch_operands = 0 : i64, tpu.core_type = #tpu.core_type<tc>, window_params = [{transform_indices = @transform_0, window_bounds = array<i64: 1, 4, 16>}, {transform_indices = @transform_1, window_bounds = array<i64: 1, 4, 16>}, {pipeline_mode = #tpu.pipeline_mode<synchronous>, transform_indices = @transform_2, window_bounds = array<i64: 3, 8, 128>}, {pipeline_mode = #tpu.pipeline_mode<synchronous>, transform_indices = @transform_3, window_bounds = array<i64: 4, 1>}, {pipeline_mode = #tpu.pipeline_mode<synchronous>, transform_indices = @transform_4, window_bounds = array<i64: 4, 1>}, {pipeline_mode = #tpu.pipeline_mode<synchronous>, transform_indices = @transform_5, window_bounds = array<i64: 4, 1>}, {transform_indices = @transform_6, window_bounds = array<i64: 1, 4, 16>}]} {
    %c0 = arith.constant 0 : index
    %c0_0 = arith.constant 0 : index
    %c0_1 = arith.constant 0 : index
    %0 = vector.load %arg2[%c0, %c0_0, %c0_1] : memref<1x4x16xf32, #tpu.memory_space<vmem>>, vector<1x4x16xf32>
    %1 = vector.shape_cast %0 : vector<1x4x16xf32> to vector<4x16xf32>
    %cst = arith.constant 0.000000e+00 : f32
    %2 = vector.broadcast %cst : f32 to vector<124x16xf32>
    %3 = tpu.concatenate %1, %2 in 0 : vector<4x16xf32>, vector<124x16xf32> -> vector<128x16xf32>
    %cst_2 = arith.constant 0.000000e+00 : f32
    %4 = vector.broadcast %cst_2 : f32 to vector<128x112xf32>
    %5 = tpu.concatenate %3, %4 in 1 : vector<128x16xf32>, vector<128x112xf32> -> vector<128x128xf32>
    %c2 = arith.constant 2 : index
    %c0_3 = arith.constant 0 : index
    %c0_4 = arith.constant 0 : index
    %6 = vector.load %arg4[%c2, %c0_3, %c0_4] : memref<3x8x128xf32, #tpu.memory_space<vmem>>, vector<1x8x128xf32>
    %7 = vector.shape_cast %6 : vector<1x8x128xf32> to vector<8x128xf32>
    %cst_5 = arith.constant dense<0.000000e+00> : vector<8x128xf32>
    %8 = tpu.matmul %7, %5, %cst_5 {dimension_numbers = #tpu.dot_dimension_numbers<[1], [0], [0], [1], [0, 0, 1, 1], [], []>} : vector<8x128xf32>, vector<128x128xf32>, vector<8x128xf32> -> vector<8x128xf32>
    %c0_6 = arith.constant 0 : index
    %c0_7 = arith.constant 0 : index
    %c0_8 = arith.constant 0 : index
    %9 = vector.load %arg3[%c0_6, %c0_7, %c0_8] : memref<1x4x16xf32, #tpu.memory_space<vmem>>, vector<1x4x16xf32>
    %10 = vector.shape_cast %9 : vector<1x4x16xf32> to vector<4x16xf32>
    %11 = vector.extract_strided_slice %10 {offsets = [0, 14], sizes = [4, 2], strides = [1, 1]} : vector<4x16xf32> to vector<4x2xf32>
    %c0_i32 = arith.constant 0 : i32
    %12 = arith.cmpi eq, %arg1, %c0_i32 : i32
    %cst_9 = arith.constant 0.000000e+00 : f32
    %13 = vector.broadcast %cst_9 : f32 to vector<4x2xf32>
    %14 = arith.select %12, %13, %11 : vector<4x2xf32>
    %cst_10 = arith.constant 0.000000e+00 : f32
    %15 = vector.broadcast %cst_10 : f32 to vector<124x2xf32>
    %16 = tpu.concatenate %14, %15 in 0 : vector<4x2xf32>, vector<124x2xf32> -> vector<128x2xf32>
    %17 = tpu.concatenate %16, %5 in 1 : vector<128x2xf32>, vector<128x128xf32> -> vector<128x130xf32>
    %c0_11 = arith.constant 0 : index
    %c0_12 = arith.constant 0 : index
    %c0_13 = arith.constant 0 : index
    %18 = vector.load %arg4[%c0_11, %c0_12, %c0_13] : memref<3x8x128xf32, #tpu.memory_space<vmem>>, vector<1x8x128xf32>
    %19 = vector.shape_cast %18 : vector<1x8x128xf32> to vector<8x128xf32>
    %20 = vector.extract_strided_slice %17 {offsets = [0, 0], sizes = [128, 128], strides = [1, 1]} : vector<128x130xf32> to vector<128x128xf32>
    %cst_14 = arith.constant dense<0.000000e+00> : vector<8x128xf32>
    %21 = tpu.matmul %19, %20, %cst_14 {dimension_numbers = #tpu.dot_dimension_numbers<[1], [0], [0], [1], [0, 0, 1, 1], [], []>} : vector<8x128xf32>, vector<128x128xf32>, vector<8x128xf32> -> vector<8x128xf32>
    %22 = arith.addf %8, %21 : vector<8x128xf32>
    %c1 = arith.constant 1 : index
    %c0_15 = arith.constant 0 : index
    %c0_16 = arith.constant 0 : index
    %23 = vector.load %arg4[%c1, %c0_15, %c0_16] : memref<3x8x128xf32, #tpu.memory_space<vmem>>, vector<1x8x128xf32>
    %24 = vector.shape_cast %23 : vector<1x8x128xf32> to vector<8x128xf32>
    %25 = vector.extract_strided_slice %17 {offsets = [0, 1], sizes = [128, 128], strides = [1, 1]} : vector<128x130xf32> to vector<128x128xf32>
    %cst_17 = arith.constant dense<0.000000e+00> : vector<8x128xf32>
    %26 = tpu.matmul %24, %25, %cst_17 {dimension_numbers = #tpu.dot_dimension_numbers<[1], [0], [0], [1], [0, 0, 1, 1], [], []>} : vector<8x128xf32>, vector<128x128xf32>, vector<8x128xf32> -> vector<8x128xf32>
    %27 = arith.addf %22, %26 : vector<8x128xf32>
    %28 = vector.extract_strided_slice %27 {offsets = [0, 0], sizes = [4, 128], strides = [1, 1]} : vector<8x128xf32> to vector<4x128xf32>
    %c0_18 = arith.constant 0 : index
    %c0_19 = arith.constant 0 : index
    %29 = vector.load %arg5[%c0_18, %c0_19] : memref<4x1xf32, #tpu.memory_space<vmem>>, vector<4x1xf32>
    %30 = vector.broadcast %29 : vector<4x1xf32> to vector<4x128xf32>
    %31 = arith.addf %28, %30 : vector<4x128xf32>
    %cst_20 = arith.constant 0.000000e+00 : f32
    %32 = vector.broadcast %cst_20 : f32 to vector<4x128xf32>
    %33 = arith.maximumf %31, %32 : vector<4x128xf32>
    %cst_21 = arith.constant dense<0.000000e+00> : vector<128xf32>
    %34 = vector.multi_reduction <add>, %33, %cst_21 [0] : vector<4x128xf32> to vector<128xf32>
    %35 = vector.shape_cast %34 : vector<128xf32> to vector<1x128xf32>
    %cst_22 = arith.constant 2.500000e-01 : f32
    %36 = vector.broadcast %cst_22 : f32 to vector<1x128xf32>
    %37 = arith.mulf %35, %36 : vector<1x128xf32>
    %38 = vector.broadcast %37 : vector<1x128xf32> to vector<4x128xf32>
    %39 = arith.subf %33, %38 : vector<4x128xf32>
    %40 = arith.mulf %39, %39 : vector<4x128xf32>
    %cst_23 = arith.constant dense<0.000000e+00> : vector<128xf32>
    %41 = vector.multi_reduction <add>, %40, %cst_23 [0] : vector<4x128xf32> to vector<128xf32>
    %42 = vector.shape_cast %41 : vector<128xf32> to vector<1x128xf32>
    %cst_24 = arith.constant 2.500000e-01 : f32
    %43 = vector.broadcast %cst_24 : f32 to vector<1x128xf32>
    %44 = arith.mulf %42, %43 : vector<1x128xf32>
    %cst_25 = arith.constant 9.99999974E-6 : f32
    %45 = vector.broadcast %cst_25 : f32 to vector<1x128xf32>
    %46 = arith.addf %44, %45 : vector<1x128xf32>
    %47 = math.rsqrt %46 : vector<1x128xf32>
    %48 = vector.broadcast %47 : vector<1x128xf32> to vector<4x128xf32>
    %49 = arith.mulf %39, %48 : vector<4x128xf32>
    %c0_26 = arith.constant 0 : index
    %c0_27 = arith.constant 0 : index
    %50 = vector.load %arg6[%c0_26, %c0_27] : memref<4x1xf32, #tpu.memory_space<vmem>>, vector<4x1xf32>
    %51 = vector.broadcast %50 : vector<4x1xf32> to vector<4x128xf32>
    %52 = arith.mulf %49, %51 : vector<4x128xf32>
    %c0_28 = arith.constant 0 : index
    %c0_29 = arith.constant 0 : index
    %53 = vector.load %arg7[%c0_28, %c0_29] : memref<4x1xf32, #tpu.memory_space<vmem>>, vector<4x1xf32>
    %54 = vector.broadcast %53 : vector<4x1xf32> to vector<4x128xf32>
    %55 = arith.addf %52, %54 : vector<4x128xf32>
    %56 = vector.extract_strided_slice %55 {offsets = [0, 0], sizes = [4, 16], strides = [1, 1]} : vector<4x128xf32> to vector<4x16xf32>
    %c0_30 = arith.constant 0 : index
    %c0_31 = arith.constant 0 : index
    %c0_32 = arith.constant 0 : index
    %57 = vector.load %arg8[%c0_30, %c0_31, %c0_32] : memref<1x4x16xf32, #tpu.memory_space<vmem>>, vector<1x4x16xf32>
    %58 = vector.shape_cast %57 : vector<1x4x16xf32> to vector<4x16xf32>
    %59 = vector.shape_cast %56 : vector<4x16xf32> to vector<1x4x16xf32>
    tpu.vector_store %arg8[%c0_30, %c0_31, %c0_32], %59 {strides = array<i32>} : memref<1x4x16xf32, #tpu.memory_space<vmem>>, vector<1x4x16xf32>,
    return
  }
  func.func @transform_0(%arg0: i32, %arg1: i32) -> (i32, i32, i32) {
    %c0_i32 = arith.constant 0 : i32
    %c0_i32_0 = arith.constant 0 : i32
    return %arg0, %c0_i32, %arg1 : i32, i32, i32
  }
  func.func @transform_1(%arg0: i32, %arg1: i32) -> (i32, i32, i32) {
    %c1_i32 = arith.constant 1 : i32
    %0 = arith.muli %arg1, %c1_i32 : i32
    %c1_i32_0 = arith.constant 1 : i32
    %1 = arith.subi %0, %c1_i32_0 : i32
    %c0_i32 = arith.constant 0 : i32
    %2 = arith.maxsi %1, %c0_i32 : i32
    %c0_i32_1 = arith.constant 0 : i32
    %c0_i32_2 = arith.constant 0 : i32
    return %arg0, %c0_i32_1, %2 : i32, i32, i32
  }
  func.func @transform_2(%arg0: i32, %arg1: i32) -> (i32, i32, i32) {
    %c0_i32 = arith.constant 0 : i32
    %c0_i32_0 = arith.constant 0 : i32
    %c0_i32_1 = arith.constant 0 : i32
    %c0_i32_2 = arith.constant 0 : i32
    return %c0_i32, %c0_i32_0, %c0_i32_1 : i32, i32, i32
  }
  func.func @transform_3(%arg0: i32, %arg1: i32) -> (i32, i32) {
    %c0_i32 = arith.constant 0 : i32
    %c0_i32_0 = arith.constant 0 : i32
    %c0_i32_1 = arith.constant 0 : i32
    return %c0_i32, %c0_i32_0 : i32, i32
  }
  func.func @transform_4(%arg0: i32, %arg1: i32) -> (i32, i32) {
    %c0_i32 = arith.constant 0 : i32
    %c0_i32_0 = arith.constant 0 : i32
    %c0_i32_1 = arith.constant 0 : i32
    return %c0_i32, %c0_i32_0 : i32, i32
  }
  func.func @transform_5(%arg0: i32, %arg1: i32) -> (i32, i32) {
    %c0_i32 = arith.constant 0 : i32
    %c0_i32_0 = arith.constant 0 : i32
    %c0_i32_1 = arith.constant 0 : i32
    return %c0_i32, %c0_i32_0 : i32, i32
  }
  func.func @transform_6(%arg0: i32, %arg1: i32) -> (i32, i32, i32) {
    %c0_i32 = arith.constant 0 : i32
    %c0_i32_0 = arith.constant 0 : i32
    return %arg0, %c0_i32, %arg1 : i32, i32, i32
  }
}

</mosaic_0001>

<bundles_post_ra>
// kernel: tpu_custom_call.1
= control target key start
LH: loop header
LB: loop body
LE: loop exit
PB: predicated region body
PF: predicated region fallthrough
CT: control target
= control target key end

     0   :  { %11 = vsyncpa [#allocation3], 0  ;;  %s1290_s0 = inlined_call_operand.vmem [shape: f32[2,4,16], index: 0, kind: input, shape index: {}]   ;;  %s1291_s1 = inlined_call_operand.vmem [shape: f32[2,4,16], index: 1, kind: input, shape index: {}]   ;;  %s1292_s2 = inlined_call_operand.hbm [shape: f32[3,8,128], index: 2, kind: input, shape index: {}]   ;;  %s1293_s3 = inlined_call_operand.vmem [shape: f32[4,1], index: 3, kind: input, shape index: {}]   ;;  %s1294_s4 = inlined_call_operand.vmem [shape: f32[4,1], index: 4, kind: input, shape index: {}]   ;;  %s1295_s5 = inlined_call_operand.vmem [shape: f32[4,1], index: 5, kind: input, shape index: {}]   ;;  %s1296_s6 = inlined_call_operand.hbm [shape: f32[2,4,16], index: 6, kind: output, shape index: {}]  }
   0x1   :  { %12 = vsyncpa [#allocation4], 0 }
   0x2   :  { %14 = vsyncpa [#allocation4 + $0x1], 0  ;;  %s1117_s21 = smov 0   ;;  %s1119_s1 = smov 0  }
   0x3   :  { %s1121_s22 = smov 0   ;;  %s1123_s23 = smov 0  }
   0x4   :  { %s1125_s24 = smov 0   ;;  %s1127_s25 = smov 0  }
   0x5 LB: > { %s755_s26 = sadd.s32 4294967295, %s1070_s25   ;;  %s756_s27 = sadd.s32 4294967294, %s1070_s25   ;;  %s1070_s25 = sphi %s1127_s25, %s20_s25   ;;  %s1066_s24 = sphi %s1125_s24, %s1305_s24   ;;  %s1062_s23 = sphi %s1123_s23, %s1304_s23   ;;  %s1058_s22 = sphi %s1121_s22, %s1303_s22   ;;  %s1054_s1 = sphi %s1119_s1, %s1302_s1   ;;  %s1050_s21 = sphi %s1117_s21, %s1301_s21  }
   0x6   : > { %s32_s28 = sadd.s32 1, %s1066_s24  ;;  %s187_s29 = sadd.s32 1, %s1058_s22 }
   0x7   : > { %p34_p0 = scmp.ge.s32.totalorder %s32_s28, 2  ;;  %p197_p1 = scmp.ne.s32.totalorder %s1058_s22, %s1054_s1 }
   0x8   : > { %p198_p2 = scmp.eq.s32.totalorder %s755_s26, 1  ;;  %p203_p3 = scmp.ne.s32.totalorder %s1054_s1, %s1050_s21 }
   0x9   : > { %s1307_s28 = smov (%p34_p0, %s32_s28), 0  ;;  %p204_p5 = scmp.eq.s32.totalorder %s756_s27, 1 }
   0xa   : > { %p1157_p4 = por %p198_p2, %p197_p1  ;;  %s182_s7 = ssub.s32 %s1066_s24, %s1307_s28 }
   0xb   : > { %p757_p6 = scmp.ge.s32.totalorder %s1070_s25, 1  ;;  %p185_p7 = scmp.eq.s32.totalorder %s182_s7, 0 }
   0xc   : > { %p1164_p8 = por %p204_p5, %p203_p3  ;;  %p211_p9 = scmp.lt.s32.totalorder %s1070_s25, 3 }
   0xd   : > { %s1170_s9 = scalar_select %p185_p7, %s1058_s22, %s187_s29  }
   0xe   : > { %p1172_p10 = pnand %p757_p6, %p211_p9  ;;  %p1176_p11 = scmp.eq.s32.totalorder %s755_s26, 0 }
   0xf   : > { %s1072_s12 = smov [#allocation2]  }
  0x10   : > { %p887_p12 = pneg %p1172_p10  ;;  %s223_s13 = sshll.u32 %s1072_s12, 4  ;;  %s224_s13 = int_to_ptr.vmem [resolvable:$true] %s223_s13 }
  0x11   : > { %s975_s14 = scalar_lea.vmem %s224_s13, 384  ;;  %p983_p5 = scmp.lt.s32.totalorder %s224_s13, %s224_s13 }
  0x12   : > { %p888_p13 = pnand %p1176_p11, %p887_p12  ;;  %p976_p1 = scmp.ne.s32.totalorder %s224_s13, %s975_s14 }
  0x13   : > { %p984_p6 = scmp.lt.s32.totalorder %s975_s14, %s975_s14 }
  0x14   : > { %p966_p0 = pneg %p888_p13 }
  0x15   : > { %p985_p7 = por %p984_p6, %p983_p5 }
  0x16   : > { %p978_p2 = pnand %p976_p1, %p966_p0 }
  0x18   : > { %p979_p3 = pneg %p978_p2 }
  0x1a   : > { %p986_p9 = pnand %p985_p7, %p979_p3 }
  0x1c   : > { %989 = shalt.err (!%p986_p9)
}
  0x1d   : > { %s1073_s15 = smov 128   ;;  %s1074_s16 = smov 8  }
  0x1e   : > { %890 = dma.hbm_to_vmem [thread:$0]  (!%p888_p13), %s1292_s2, 384, %s224_s13, [#allocation3], %s1073_s15, %s1073_s15, %s1074_s16  }
  0x1f   : > { %274 = sbr.rel (%p1172_p10) target bundleno = 577 (0x241), region = 44 }
  0x24   : > { %1041 = dma.done.wait (%p1176_p11), [#allocation3], 384  }
  0x25   : > { %1043 = vsyncadd (%p1176_p11), [#allocation3], 4294966912  ;;  %v1075_v0 = vmov 0.0   ;;  %s1076_s19 = smov 114   ;;  %p316_p12 = scmp.lt.s32.totalorder %s1062_s23, 1  ;;  %vm337_vm0 = vcmask 1043456  }
  0x26   : > { %354 = vrot.lane.b32.xlu0 %v1075_v0, %s1076_s19  ;;  %352 = vrot.lane.b32.xlu1 %v1075_v0, %s1076_s19  ;;  %s1077_s26 = smov 2   ;;  %vm339_vm1 = vcmask 130048   ;;  %vm1078_vm2 = vmmov 0   ;;  %v342_v4 = vld [vmem:[#allocation2 + $0x10] sm:$0xff]  ;;  %vm365_vm3 = vcmask 15360   ;;  %s1079_s11 = smov 127  }
  0x27   : > { %806 = vmatprep.subr.mxu0 %v1075_v0  ;;  %841 = vmatprep.subr.mxu1 %v1075_v0  ;;  %s317_s20 = scalar_select %p316_p12, %s1062_s23, 1  ;;  %v597_v12 = vld [vmem:[%s1293_s3] sm:$0xf]  ;;  %v1080_v13 = vmov 0   ;;  %vm521_vm4 = vcmask 1039360   ;;  %v510_v23 = vld [vmem:[#allocation2 + $0x8] sm:$0xff] }
  0x28   : > { %843 = vmatprep.mubr.msk.f32.mxu1 %vm1078_vm2, %v1075_v0  ;;  %838 = vmatprep.mubr.msk.f32.mxu0 %vm1078_vm2, %v1075_v0  ;;  %v626_v14 = vld [vmem:[%s1294_s4] sm:$0xf]  ;;  %s313_s18 = sand.u32 1, %s1054_s1   ;;  %vm640_vm5 = vcmask 125952   ;;  %s1081_s13 = smov [#allocation5]  }
  0x29   : > { %s763_s27 = sshll.u32 %s317_s20, 2  ;;  %960 = vset.pattern.permute.xlu1 %v1080_v13  ;;  %v633_v15 = vld [vmem:[%s1295_s5] sm:$0xf]  ;;  %961 = vset.pattern.permute.xlu0 %v1080_v13  ;;  %s762_s19 = sshll.u32 %s313_s18, 2 }
  0x2a   : > { %361 = vrot.lane.b32.xlu0 %v1075_v0, %s1077_s26  ;;  %s322_s10 = scalar_lea.vmem %s1290_s0, %s763_s27  ;;  %v368_v16 = vld [vmem:[#allocation2] sm:$0xff]  ;;  %s767_s20 = sshll.u32 %s1062_s23, 6 }
  0x2b   : > { %v336_v1 = vld [vmem:[%s322_s10] sm:$0xf]  ;;  %s655_s10 = scalar_lea.hbm %s1296_s6, %s767_s20  ;;  %s994_s23 = sshll.u32 %s1081_s13, 4  ;;  %s995_s23 = int_to_ptr.vmem [resolvable:$false] %s994_s23 }
  0x2c   : > { %v338_v2 = vsel %vm337_vm0, %v336_v1, 0.0  ;;  %s996_s14 = scalar_lea.vmem %s995_s23, 128 }
  0x2d   : > { %v340_v3 = vsel %vm339_vm1, %v338_v2, 0.0  ;;  %842 = vmatpush3.msk.msra.mxu1 %vm339_vm1, %v338_v2 }
  0x2e   : > { %359 = vrot.lane.b32.xlu1 %v340_v3, %s1077_s26  ;;  %846 = vmatprep.subr.mxu1 %v1075_v0  ;;  %s315_s26 = scalar_lea.vmem [#allocation5], %s762_s19 }
  0x2f   : > { %844 = vmatmul.mubr.f32.vlgmr.msra.gmra.mxu1 %v342_v4  ;;  %s657_s27 = sshll.u32 %s315_s26, 4  ;;  %s658_s27 = int_to_ptr.vmem [resolvable:$true] %s657_s27 }
  0x30   : > { %878 = vmatprep.mubr.msk.f32.mxu1 %vm1078_vm2, %v1075_v0  ;;  %s990_s12 = scalar_lea.vmem %s658_s27, 64  ;;  %p997_p0 = scmp.lt.s32.totalorder %s658_s27, %s995_s23 }
  0x31   : > { %p991_p10 = scmp.ne.s32.totalorder %s658_s27, %s990_s12  ;;  %p998_p1 = scmp.lt.s32.totalorder %s996_s14, %s990_s12 }
  0x33   : > { %p992_p11 = pnand %p991_p10, %p1157_p4  ;;  %p999_p2 = por %p998_p1, %p997_p0 }
  0x35   : > { %p993_p13 = pneg %p992_p11 }
  0x37   : > { %p1000_p3 = pnand %p999_p2, %p993_p13 }
  0x98   : > { %v355_v5 = vpop.permute.xlu0 %354  ;;  %v353_v6 = vpop.permute.xlu1 %352 }
  0x9c   : > { %v362_v7 = vpop.permute.xlu0 %361 }
  0x9d   : > { %v367_v8 = vsel %vm365_vm3, %v355_v5, %v362_v7 }
  0x9e   : > { %v955_v9 = vpack.i.bf16 %v362_v7, %v367_v8  ;;  %807 = vmatpush3.msra.mxu0 %v367_v8 }
  0x9f   : > { %808 = vmatprep.subr.mxu0 %v1075_v0 }
  0xa0   : > { %956 = vrot.lane.b32.xlu0 %v955_v9, %s1079_s11  ;;  %809 = vmatpush3.msra.mxu0 %v367_v8  ;;  %v360_v10 = vpop.permute.xlu1 %359 }
  0xa1   : > { %810 = vmatprep.subr.mxu0 %v1075_v0  ;;  %v366_v11 = vsel %vm365_vm3, %v353_v6, %v360_v10 }
  0xa2   : > { %811 = vmatpush3.msra.mxu0 %v367_v8  ;;  %513 = vrot.lane.b32.xlu1 %v366_v11, %s1079_s11 }
  0xa3   : > { %812 = vmatprep.subr.mxu0 %v1075_v0 }
  0xa4   : > { %813 = vmatpush3.msra.mxu0 %v367_v8  ;;  %515 = vrot.lane.b32.xlu0 %v360_v10, %s1079_s11  ;;  %s643_s11 = scalar_lea.sflag [#allocation4], %s313_s18 }
  0xa5   : > { %814 = vmatprep.subr.mxu0 %v1075_v0 }
  0xa6   : > { %815 = vmatpush3.msra.mxu0 %v367_v8  ;;  %600 = vperm.xlu1 %960, %v597_v12  }
  0xa7   : > { %816 = vmatprep.subr.mxu0 %v1075_v0 }
  0xa8   : > { %817 = vmatpush3.msra.mxu0 %v367_v8  ;;  %629 = vperm.xlu0 %961, %v626_v14  }
  0xa9   : > { %818 = vmatprep.subr.mxu0 %v1075_v0 }
  0xaa   : > { %819 = vmatpush3.msra.mxu0 %v367_v8  ;;  %636 = vperm.xlu1 %960, %v633_v15  }
  0xab   : > { %820 = vmatprep.subr.mxu0 %v1075_v0 }
  0xac   : > { %821 = vmatpush3.msra.mxu0 %v367_v8 }
  0xad   : > { %822 = vmatprep.subr.mxu0 %v1075_v0 }
  0xae   : > { %823 = vmatpush3.msra.mxu0 %v367_v8 }
  0xaf   : > { %824 = vmatprep.subr.mxu0 %v1075_v0 }
  0xb0   : > { %825 = vmatpush3.msra.mxu0 %v367_v8 }
  0xb1   : > { %826 = vmatprep.subr.mxu0 %v1075_v0 }
  0xb2   : > { %827 = vmatpush3.msra.mxu0 %v367_v8 }
  0xb3   : > { %828 = vmatprep.subr.mxu0 %v1075_v0 }
  0xb4   : > { %829 = vmatpush3.msra.mxu0 %v367_v8 }
  0xb5   : > { %830 = vmatprep.subr.mxu0 %v1075_v0 }
  0xb6   : > { %831 = vmatpush3.msra.mxu0 %v367_v8 }
  0xb7   : > { %832 = vmatprep.subr.mxu0 %v1075_v0 }
  0xb8   : > { %833 = vmatpush3.msra.mxu0 %v367_v8 }
  0xb9   : > { %834 = vmatprep.subr.mxu0 %v1075_v0 }
  0xba   : > { %835 = vmatpush3.msra.mxu0 %v367_v8 }
  0xbb   : > { %836 = vmatprep.subr.mxu0 %v1075_v0 }
  0xbc   : > { %837 = vmatpush3.msra.mxu0 %v366_v11 }
  0xbd   : > { %839 = vmatmul.mubr.f32.vlgmr.msra.gmra.mxu0 %v368_v16 }
  0xef   : > { %v505_v25 = vpop.f32.mrf.mxu1 }
  0xf1   : > { %v845_v26 = vpop.f32.mrf.mxu1 }
 0x112   : > { %v957_v17 = vpop.permute.xlu0 %956 }
 0x113   : > { %v959_v18 = vunpack.i.h.bf16 %v957_v17  ;;  %v958_v19 = vunpack.i.l.bf16 %v957_v17 }
 0x114   : > { %v514_v21 = vpop.permute.xlu1 %513 }
 0x115   : > { %v523_v20 = vsel %vm521_vm4, %v958_v19, %v959_v18 }
 0x116   : > { %847 = vmatpush3.msra.mxu1 %v523_v20  ;;  %v516_v22 = vpop.permute.xlu0 %515 }
 0x117   : > { %848 = vmatprep.subr.mxu1 %v1075_v0  ;;  %v522_v24 = vsel %vm521_vm4, %v514_v21, %v516_v22 }
 0x118   : > { %849 = vmatpush3.msra.mxu1 %v523_v20 }
 0x119   : > { %850 = vmatprep.subr.mxu1 %v1075_v0 }
 0x11a   : > { %851 = vmatpush3.msra.mxu1 %v523_v20 }
 0x11b   : > { %852 = vmatprep.subr.mxu1 %v1075_v0 }
 0x11c   : > { %853 = vmatpush3.msra.mxu1 %v523_v20 }
 0x11d   : > { %854 = vmatprep.subr.mxu1 %v1075_v0 }
 0x11e   : > { %855 = vmatpush3.msra.mxu1 %v523_v20 }
 0x11f   : > { %856 = vmatprep.subr.mxu1 %v1075_v0 }
 0x120   : > { %857 = vmatpush3.msra.mxu1 %v523_v20 }
 0x121   : > { %858 = vmatprep.subr.mxu1 %v1075_v0  ;;  %v601_v32 = vpop.permute.xlu1 %600 }
 0x122   : > { %859 = vmatpush3.msra.mxu1 %v523_v20 }
 0x123   : > { %860 = vmatprep.subr.mxu1 %v1075_v0  ;;  %v630_v56 = vpop.permute.xlu0 %629 }
 0x124   : > { %861 = vmatpush3.msra.mxu1 %v523_v20 }
 0x125   : > { %862 = vmatprep.subr.mxu1 %v1075_v0  ;;  %v637_v59 = vpop.permute.xlu1 %636 }
 0x126   : > { %863 = vmatpush3.msra.mxu1 %v523_v20 }
 0x127   : > { %864 = vmatprep.subr.mxu1 %v1075_v0 }
 0x128   : > { %865 = vmatpush3.msra.mxu1 %v523_v20 }
 0x129   : > { %866 = vmatprep.subr.mxu1 %v1075_v0 }
 0x12a   : > { %867 = vmatpush3.msra.mxu1 %v523_v20 }
 0x12b   : > { %868 = vmatprep.subr.mxu1 %v1075_v0 }
 0x12c   : > { %869 = vmatpush3.msra.mxu1 %v523_v20 }
 0x12d   : > { %870 = vmatprep.subr.mxu1 %v1075_v0 }
 0x12e   : > { %871 = vmatpush3.msra.mxu1 %v523_v20 }
 0x12f   : > { %872 = vmatprep.subr.mxu1 %v1075_v0 }
 0x130   : > { %873 = vmatpush3.msra.mxu1 %v523_v20 }
 0x131   : > { %874 = vmatprep.subr.mxu1 %v1075_v0 }
 0x132   : > { %875 = vmatpush3.msra.mxu1 %v523_v20 }
 0x133   : > { %876 = vmatprep.subr.mxu1 %v1075_v0 }
 0x134   : > { %877 = vmatpush3.msra.mxu1 %v522_v24 }
 0x135   : > { %879 = vmatmul.mubr.f32.vlgmr.msra.gmra.mxu1 %v510_v23 }
 0x17d   : > { %v435_v27 = vpop.f32.mrf.mxu0 }
 0x17e   : > { %v506_v28 = vadd.f32 %v505_v25, %v435_v27 }
 0x17f   : > { %v840_v29 = vpop.f32.mrf.mxu0 }
 0x1f5   : > { %v592_v30 = vpop.f32.mrf.mxu1 }
 0x1f6   : > { %v596_v31 = vadd.f32 %v592_v30, %v506_v28 }
 0x1f7   : > { %v880_v33 = vpop.f32.mrf.mxu1 }
 0x1f8   : > { %v603_v34 = vadd.f32 %v601_v32, %v596_v31 }
 0x1fa   : > { %v604_v35 = vmax.f32 %v603_v34, 0.0 }
 0x1fc   : > { %v605_v36 = vsel %vm337_vm0, %v604_v35, 0.0 }
 0x1fd   : > { %v606_v37 = vrot.slane %v605_v36, 4 }
 0x1ff   : > { %v607_v38 = vadd.f32 %v606_v37, %v605_v36 }
 0x201   : > { %v608_v39 = vrot.slane %v607_v38, 2 }
 0x203   : > { %v609_v40 = vadd.f32 %v608_v39, %v607_v38 }
 0x205   : > { %v610_v41 = vrot.slane %v609_v40, 1 }
 0x207   : > { %v611_v42 = vadd.f32 %v610_v41, %v609_v40 }
 0x209   : > { %v612_v43 = vmul.f32 0.25, %v611_v42 }
 0x20b   : > { %v613_v44 = vsub.f32 %v604_v35, %v612_v43 }
 0x20d   : > { %v614_v45 = vmul.f32 %v613_v44, %v613_v44 }
 0x20f   : > { %v615_v46 = vsel %vm337_vm0, %v614_v45, 0.0 }
 0x210   : > { %v616_v47 = vrot.slane %v615_v46, 4 }
 0x212   : > { %v617_v48 = vadd.f32 %v616_v47, %v615_v46 }
 0x214   : > { %v618_v49 = vrot.slane %v617_v48, 2 }
 0x216   : > { %v619_v50 = vadd.f32 %v618_v49, %v617_v48 }
 0x218   : > { %v620_v51 = vrot.slane %v619_v50, 1 }
 0x21a   : > { %v621_v52 = vadd.f32 %v620_v51, %v619_v50 }
 0x21c   : > { %v622_v53 = vmul.f32 0.25, %v621_v52 }
 0x21e   : > { %v623_v54 = vadd.f32 1e-05, %v622_v53 }
 0x220   : > { %962 = vrsqrt.f32 %v623_v54 }
 0x22d   : > { %v963_v55 = vpop.eup %962 }
 0x22e   : > { %v625_v57 = vmul.f32 %v963_v55, %v613_v44 }
 0x230   : > { %v632_v58 = vmul.f32 %v630_v56, %v625_v57 }
 0x232   : > { %v639_v60 = vadd.f32 %v637_v59, %v632_v58 }
 0x234   : > { %641 = vst.msk [vmem:[%s315_s26] sm:$0xf] %vm640_vm5, %v639_v60 }
 0x235   : > { %1003 = shalt.err (!%p1000_p3)
}
 0x236   : > { %s1004_s15 = scalar_lea.hbm %s655_s10, 64  ;;  %s1008_s18 = scalar_lea.hbm %s1296_s6, 128 }
 0x237   : > { %p1005_p5 = scmp.ne.s32.totalorder %s655_s10, %s1004_s15  ;;  %p1009_p9 = scmp.lt.s32.totalorder %s655_s10, %s1296_s6 }
 0x238   : > { %p1010_p12 = scmp.lt.s32.totalorder %s1008_s18, %s1004_s15 }
 0x239   : > { %p1006_p6 = pnand %p1005_p5, %p1157_p4 }
 0x23a   : > { %p1011_p10 = por %p1010_p12, %p1009_p9 }
 0x23b   : > { %p1007_p7 = pneg %p1006_p6 }
 0x23d   : > { %p1012_p11 = pnand %p1011_p10, %p1007_p7 }
 0x23f   : > { %1015 = shalt.err (!%p1012_p11)
}
 0x240   : > { %885 = dma.vmem_to_hbm [thread:$0]  (%p1157_p4), %s658_s27, 64, %s655_s10, %s643_s11  }
 0x241 PF: > { %p897_p13 = scmp.ge.s32.totalorder %s1070_s25, 2  ;;  %s669_s26 = sand.u32 1, %s1050_s21  }
 0x242   : > { %s670_s29 = scalar_lea.sflag [#allocation4], %s669_s26 }
 0x243   : > { %p892_p0 = pnand %p897_p13, %p1164_p8 }
 0x245   : > { %p893_p1 = pneg %p892_p0 }
 0x247   : > { %1045 = dma.done.wait (%p893_p1), %s670_s29, 64  }
 0x248   : > { %1047 = vsyncadd (%p893_p1), %s670_s29, 4294967232  ;;  %s20_s25 = sadd.s32 1, %s1070_s25   ;;  %s1301_s21 = smov %s1054_s1 }
 0x249   : > { %p17_p2 = scmp.ge.s32.totalorder %s20_s25, 4   ;;  %s1302_s1 = smov %s1058_s22 }
 0x24a   : > { %s1303_s22 = smov %s1170_s9  ;;  %s1304_s23 = smov %s1066_s24 }
 0x24b   : > { %s1305_s24 = smov %s1307_s28  ;;  %19 = sbr.rel (!%p17_p2) target bundleno = 5 (0x5), region = 89 }
 0x250   :  { %675 = vsyncpa [#allocation3], 1 }
 0x251   :  { %677 = vsyncpa [#allocation3 + $0x1], 1 }
 0x252   :  { %678 = vsyncpa [#allocation4], 1 }
 0x253   :  { %680 = vsyncpa [#allocation4 + $0x1], 1 }

</bundles_post_ra>
